<compile_context>
chip_gen: v7x
topology: tpu7x:2x2x1
jax: 0.10.0
libtpu: 0.0.40
codegen_flags: <defaults>
</compile_context>

<pallas_src>
import math

import jax
import jax.numpy as jnp
from jax.experimental import pallas as pl
from jax.experimental.pallas import tpu as pltpu


# ---------------------------------------------------------------------------
# Kernels
# ---------------------------------------------------------------------------

def _se_fused_kernel(x_ref, w1_ref, w2_ref, o_ref):
    """Single-pass SE (squeeze + excite + scale) for one batch element.

    x_ref / o_ref: (1, HW, C)   channels-last: C on lanes, HW on sublanes
    w1_ref: (C, Hmid)           w2_ref: (Hmid, C)
    """
    # Squeeze: mean over the spatial (sublane) axis, accumulated in f32.
    pooled = jnp.mean(x_ref[...].astype(jnp.float32), axis=1)            # (1, C)

    # Excite: Linear -> ReLU -> Linear -> Sigmoid. Tiny matmuls, fully hidden
    # under the HBM-bound scale/store phase; weights stay resident in VMEM.
    h = jnp.maximum(
        jnp.dot(pooled, w1_ref[...], preferred_element_type=jnp.float32), 0.0
    )                                                                     # (1, Hmid)
    gate = jax.nn.sigmoid(
        jnp.dot(h, w2_ref[...], preferred_element_type=jnp.float32)
    )                                                                     # (1, C)

    # Scale: keep the dominant elementwise/store path in the input dtype.
    o_ref[...] = x_ref[...] * gate[:, None, :].astype(o_ref.dtype)


def _se_scale_kernel(x_ref, g_ref, o_ref):
    """Two-pass scale kernel: o = x * gate, gate broadcast over the HW tile.

    x_ref / o_ref: (1, HW_tile, C)    g_ref: (1, 1, C)
    """
    o_ref[...] = x_ref[...] * g_ref[...].astype(o_ref.dtype)


# ---------------------------------------------------------------------------
# Wrapper
# ---------------------------------------------------------------------------

def _round_down_mult(x, m):
    return (x // m) * m


def se_layer(x, w1, w2, *, single_pass_max_bytes=4 << 20, hw_tile=None):
    """SE layer forward.  x: (B, C, H, W); w1: (C, Hmid); w2: (Hmid, C)."""
    b, c, hgt, wid = x.shape
    hw = hgt * wid
    itemsize = jnp.dtype(x.dtype).itemsize

    # Channels-last flat layout for the kernel (lane axis = C, sublane = HW).
    # TODO(synk): in a real NHWC pipeline these wrapper transposes disappear.
    x_flat = jnp.transpose(x, (0, 2, 3, 1)).reshape(b, hw, c)

    w_bytes = int((w1.size + w2.size) * 4)
    slab_bytes = hw * c * itemsize

    if hw_tile is None and slab_bytes <= single_pass_max_bytes:
        # ------------- single pass: 1 read + 1 write of x over HBM ----------
        vmem_limit = int(
            min(max(4 * slab_bytes + w_bytes + (2 << 20), 8 << 20), 48 << 20)
        )
        cost = pl.CostEstimate(
            flops=2 * b * hw * c + 4 * b * c * int(w1.shape[1]),
            transcendentals=b * c,
            bytes_accessed=2 * b * hw * c * itemsize + w_bytes,
        )
        out = pl.pallas_call(
            _se_fused_kernel,
            out_shape=jax.ShapeDtypeStruct((b, hw, c), x.dtype),
            grid_spec=pltpu.PrefetchScalarGridSpec(
                num_scalar_prefetch=0,
                grid=(b,),
                in_specs=[
                    pl.BlockSpec((1, hw, c), lambda i: (i, 0, 0)),
                    pl.BlockSpec(w1.shape, lambda i: (0, 0)),   # resident
                    pl.BlockSpec(w2.shape, lambda i: (0, 0)),   # resident
                ],
                out_specs=pl.BlockSpec((1, hw, c), lambda i: (i, 0, 0)),
            ),
            compiler_params=pltpu.CompilerParams(
                dimension_semantics=("parallel",),
                vmem_limit_bytes=vmem_limit,
            ),
            cost_estimate=cost,
        )(x_flat, w1, w2)
    else:
        # -------- two pass: per-batch slab too large for VMEM residency -----
        # Pass 1: gate (B, C) via plain XLA (full-HW mean must precede scaling).
        pooled = jnp.mean(x_flat.astype(jnp.float32), axis=1)             # (B, C)
        gate = jax.nn.sigmoid(jnp.maximum(pooled @ w1, 0.0) @ w2)         # (B, C)
        gate = gate.reshape(b, 1, c)

        # Pass 2: Pallas elementwise scale tiled over (batch, HW tiles).
        if hw_tile is None:
            hw_tile = max(8, _round_down_mult((2 << 20) // (c * itemsize), 8))
        hw_tile = hw if hw_tile >= hw else int(hw_tile)
        n_hw = pl.cdiv(hw, hw_tile)

        block_bytes = hw_tile * c * itemsize
        vmem_limit = int(min(max(4 * block_bytes + (2 << 20), 8 << 20), 48 << 20))
        cost = pl.CostEstimate(
            flops=b * hw * c,
            transcendentals=0,
            bytes_accessed=2 * b * hw * c * itemsize + int(gate.size) * 4,
        )
        out = pl.pallas_call(
            _se_scale_kernel,
            out_shape=jax.ShapeDtypeStruct((b, hw, c), x.dtype),
            grid_spec=pltpu.PrefetchScalarGridSpec(
                num_scalar_prefetch=0,
                grid=(b, n_hw),
                in_specs=[
                    pl.BlockSpec((1, hw_tile, c), lambda i, j: (i, j, 0)),
                    pl.BlockSpec((1, 1, c), lambda i, j: (i, 0, 0)),
                ],
                out_specs=pl.BlockSpec((1, hw_tile, c), lambda i, j: (i, j, 0)),
            ),
            compiler_params=pltpu.CompilerParams(
                dimension_semantics=("parallel", "parallel"),
                vmem_limit_bytes=vmem_limit,
            ),
            cost_estimate=cost,
        )(x_flat, gate)

    return jnp.transpose(out.reshape(b, hgt, wid, c), (0, 3, 1, 2))


# ---------------------------------------------------------------------------
# Params / reference
# ---------------------------------------------------------------------------

def make_params(channel, reduction=16, key=None):
    """Deterministic init matching nn.Linear default (Kaiming-uniform-ish)."""
    hidden = max(8, channel // reduction)
    k1, k2 = jax.random.split(key, 2)
    # PyTorch nn.Linear weight is (out, in); stored transposed for x @ W.
    bound1 = 1.0 / math.sqrt(channel)
    bound2 = 1.0 / math.sqrt(hidden)
    w1 = jax.random.uniform(k1, (channel, hidden), jnp.float32, -bound1, bound1)
    w2 = jax.random.uniform(k2, (hidden, channel), jnp.float32, -bound2, bound2)
    return w1, w2


def se_layer_ref(x, w1, w2):
    """Pure-JAX reference mirroring the PyTorch forward."""
    y = jnp.mean(x, axis=(2, 3))                      # (B, C)
    y = jnp.maximum(y @ w1, 0.0)                      # (B, Hmid)
    y = jax.nn.sigmoid(y @ w2)                        # (B, C)
    return x * y[:, :, None, None]


if __name__ == "__main__":
    key = jax.random.PRNGKey(0)
    kx, kp = jax.random.split(key)

    B, C, H, W = 2, 4, 16, 16
    x = jax.random.normal(kx, (B, C, H, W), dtype=jnp.float32)
    w1, w2 = make_params(C, reduction=16, key=kp)

    ref = se_layer_ref(x, w1, w2)

    # Single-pass (fused squeeze+excite+scale) path.
    out = jax.block_until_ready(se_layer(x, w1, w2))
    assert out.shape == (B, C, H, W)
    assert jnp.allclose(out, ref, atol=1e-5, rtol=1e-5), "fused path mismatch"

    # Two-pass (XLA gate + Pallas tiled scale) path, forced for coverage.
    out2 = jax.block_until_ready(
        se_layer(x, w1, w2, single_pass_max_bytes=0, hw_tile=64)
    )
    assert jnp.allclose(out2, ref, atol=1e-5, rtol=1e-5), "two-pass mismatch"

    print("KERNEL_OK")
</pallas_src>

<mosaic_0001>
module attributes {stable_mosaic.version = 11 : i64} {
  func.func @_se_fused_kernel(%arg0: i32, %arg1: memref<1x256x4xf32, #tpu.memory_space<vmem>>, %arg2: memref<4x8xf32, #tpu.memory_space<vmem>>, %arg3: memref<8x4xf32, #tpu.memory_space<vmem>>, %arg4: memref<1x256x4xf32, #tpu.memory_space<vmem>>) attributes {dimension_semantics = [#tpu.dimension_semantics<parallel>], iteration_bounds = array<i64: 2>, scalar_prefetch = 0 : i64, scratch_operands = 0 : i64, tpu.core_type = #tpu.core_type<tc>, window_params = [{transform_indices = @transform_0, window_bounds = array<i64: 1, 256, 4>}, {pipeline_mode = #tpu.pipeline_mode<synchronous>, transform_indices = @transform_1, window_bounds = array<i64: 4, 8>}, {pipeline_mode = #tpu.pipeline_mode<synchronous>, transform_indices = @transform_2, window_bounds = array<i64: 8, 4>}, {transform_indices = @transform_3, window_bounds = array<i64: 1, 256, 4>}]} {
    %c0 = arith.constant 0 : index
    %c0_0 = arith.constant 0 : index
    %c0_1 = arith.constant 0 : index
    %0 = vector.load %arg1[%c0, %c0_0, %c0_1] : memref<1x256x4xf32, #tpu.memory_space<vmem>>, vector<1x256x4xf32>
    %cst = arith.constant dense<0.000000e+00> : vector<1x4xf32>
    %1 = vector.multi_reduction <add>, %0, %cst [1] : vector<1x256x4xf32> to vector<1x4xf32>
    %cst_2 = arith.constant 2.560000e+02 : f32
    %2 = vector.broadcast %cst_2 : f32 to vector<1x4xf32>
    %3 = arith.divf %1, %2 : vector<1x4xf32>
    %c0_3 = arith.constant 0 : index
    %c0_4 = arith.constant 0 : index
    %4 = vector.load %arg2[%c0_3, %c0_4] : memref<4x8xf32, #tpu.memory_space<vmem>>, vector<4x8xf32>
    %cst_5 = arith.constant dense<0.000000e+00> : vector<1x8xf32>
    %5 = tpu.matmul %3, %4, %cst_5 {dimension_numbers = #tpu.dot_dimension_numbers<[1], [0], [0], [1], [0, 0, 1, 1], [], []>} : vector<1x4xf32>, vector<4x8xf32>, vector<1x8xf32> -> vector<1x8xf32>
    %cst_6 = arith.constant 0.000000e+00 : f32
    %6 = vector.broadcast %cst_6 : f32 to vector<1x8xf32>
    %7 = arith.maximumf %5, %6 : vector<1x8xf32>
    %c0_7 = arith.constant 0 : index
    %c0_8 = arith.constant 0 : index
    %8 = vector.load %arg3[%c0_7, %c0_8] : memref<8x4xf32, #tpu.memory_space<vmem>>, vector<8x4xf32>
    %cst_9 = arith.constant dense<0.000000e+00> : vector<1x4xf32>
    %9 = tpu.matmul %7, %8, %cst_9 {dimension_numbers = #tpu.dot_dimension_numbers<[1], [0], [0], [1], [0, 0, 1, 1], [], []>} : vector<1x8xf32>, vector<8x4xf32>, vector<1x4xf32> -> vector<1x4xf32>
    %10 = arith.negf %9 : vector<1x4xf32>
    %11 = math.exp %10 : vector<1x4xf32>
    %cst_10 = arith.constant 1.000000e+00 : f32
    %12 = vector.broadcast %cst_10 : f32 to vector<1x4xf32>
    %13 = arith.addf %12, %11 : vector<1x4xf32>
    %14 = arith.divf %12, %13 : vector<1x4xf32>
    %c0_11 = arith.constant 0 : index
    %c0_12 = arith.constant 0 : index
    %c0_13 = arith.constant 0 : index
    %15 = vector.load %arg1[%c0_11, %c0_12, %c0_13] : memref<1x256x4xf32, #tpu.memory_space<vmem>>, vector<1x256x4xf32>
    %16 = vector.shape_cast %14 : vector<1x4xf32> to vector<1x1x4xf32>
    %17 = vector.broadcast %16 : vector<1x1x4xf32> to vector<1x256x4xf32>
    %18 = arith.mulf %15, %17 : vector<1x256x4xf32>
    %c0_14 = arith.constant 0 : index
    %c0_15 = arith.constant 0 : index
    %c0_16 = arith.constant 0 : index
    %19 = vector.load %arg4[%c0_14, %c0_15, %c0_16] : memref<1x256x4xf32, #tpu.memory_space<vmem>>, vector<1x256x4xf32>
    tpu.vector_store %arg4[%c0_14, %c0_15, %c0_16], %18 {strides = array<i32>} : memref<1x256x4xf32, #tpu.memory_space<vmem>>, vector<1x256x4xf32>,
    return
  }
  func.func @transform_0(%arg0: i32) -> (i32, i32, i32) {
    %c0_i32 = arith.constant 0 : i32
    %c0_i32_0 = arith.constant 0 : i32
    %c0_i32_1 = arith.constant 0 : i32
    return %arg0, %c0_i32, %c0_i32_0 : i32, i32, i32
  }
  func.func @transform_1(%arg0: i32) -> (i32, i32) {
    %c0_i32 = arith.constant 0 : i32
    %c0_i32_0 = arith.constant 0 : i32
    %c0_i32_1 = arith.constant 0 : i32
    return %c0_i32, %c0_i32_0 : i32, i32
  }
  func.func @transform_2(%arg0: i32) -> (i32, i32) {
    %c0_i32 = arith.constant 0 : i32
    %c0_i32_0 = arith.constant 0 : i32
    %c0_i32_1 = arith.constant 0 : i32
    return %c0_i32, %c0_i32_0 : i32, i32
  }
  func.func @transform_3(%arg0: i32) -> (i32, i32, i32) {
    %c0_i32 = arith.constant 0 : i32
    %c0_i32_0 = arith.constant 0 : i32
    %c0_i32_1 = arith.constant 0 : i32
    return %arg0, %c0_i32, %c0_i32_0 : i32, i32, i32
  }
}

</mosaic_0001>

<bundles_post_ra>
// kernel: tpu_custom_call.1
= control target key start
LH: loop header
LB: loop body
LE: loop exit
PB: predicated region body
PF: predicated region fallthrough
CT: control target
= control target key end

     0   :  { %s633_s12 = smov 0   ;;  %s924_s0 = inlined_call_operand.vmem [shape: f32[2,256,4], index: 0, kind: input, shape index: {}]   ;;  %s925_s1 = inlined_call_operand.vmem [shape: f32[4,8], index: 1, kind: input, shape index: {}]   ;;  %s926_s2 = inlined_call_operand.vmem [shape: f32[8,4], index: 2, kind: input, shape index: {}]   ;;  %s927_s3 = inlined_call_operand.vmem [shape: f32[2,256,4], index: 3, kind: output, shape index: {}]  }
   0x1 LB: > { %s558_s13 = sadd.s32 4294967295, %s609_s12   ;;  %p562_p0 = scmp.ge.s32.totalorder %s609_s12, 1  ;;  %s609_s12 = sphi %s633_s12, %s13_s12  }
   0x2   : > { %p137_p1 = scmp.lt.s32.totalorder %s609_s12, 3 }
   0x4   : > { %p138_p2 = pnand %p562_p0, %p137_p1 }
   0x5   : > { %v275_v0 = vld [vmem:[%s925_s1] sm:$0xf] (!%p138_p2)  ;;  %vm279_vm0 = vcmask (!%p138_p2), 1043456   ;;  %p161_p3 = scmp.lt.s32.totalorder (!%p138_p2), %s558_s13, 1  ;;  %v611_v1 = vmov (!%p138_p2), 0.0   ;;  %vm612_vm1 = vmmov (!%p138_p2), 0  }
   0x6   : > { %141 = sbr.rel (%p138_p2) target bundleno = 567 (0x237), region = 32  ;;  %579 = vmatprep.subr.mxu0 (!%p138_p2), %v611_v1  ;;  %581 = vmatprep.mubr.msk.f32.mxu0 (!%p138_p2), %vm612_vm1, %v611_v1  ;;  %vm203_vm2 = vcmask (!%p138_p2), 31744   ;;  %vm355_vm3 = vcmask (!%p138_p2), 64512  }
   0x7   : > { %580 = vmatpush3.msk.msra.mxu0 (!%p138_p2), %vm279_vm0, %v275_v0  ;;  %584 = vmatprep.subr.mxu1 (!%p138_p2), %v611_v1 }
   0x8   : > { %586 = vmatprep.mubr.msk.f32.mxu1 (!%p138_p2), %vm612_vm1, %v611_v1 }
   0xd   : > { %s929_s13 = smov (!%p161_p3, %s558_s13), 1 }
   0xe   : > { %s573_s16 = sshll.u32 %s929_s13, 8 }
   0xf   : > { %s652_s19 = scalar_lea.vmem %s924_s0, %s573_s16  ;;  %s823_s24 = scalar_lea.vmem %s927_s3, %s573_s16 }
  0x10   : > { %v655_v2 = vld [vmem:[%s652_s19] sm:$0xff]  ;;  %v658_v3 = vld [vmem:[%s652_s19 + $0x8] sm:$0xff]  ;;  %v661_v4 = vld [vmem:[%s652_s19 + $0x10] sm:$0xff] }
  0x11   : > { %v664_v5 = vld [vmem:[%s652_s19 + $0x18] sm:$0xff]  ;;  %v204_v6 = vsel %vm203_vm2, %v655_v2, 0.0  ;;  %v205_v7 = vsel %vm203_vm2, %v658_v3, 0.0  ;;  %v207_v8 = vsel %vm203_vm2, %v661_v4, 0.0  ;;  %v673_v9 = vld [vmem:[%s652_s19 + $0x20] sm:$0xff]  ;;  %v678_v12 = vld [vmem:[%s652_s19 + $0x28] sm:$0xff] }
  0x12   : > { %v206_v10 = vadd.f32 %v205_v7, %v204_v6  ;;  %v209_v11 = vsel %vm203_vm2, %v664_v5, 0.0  ;;  %v211_v14 = vsel %vm203_vm2, %v673_v9, 0.0  ;;  %v683_v15 = vld [vmem:[%s652_s19 + $0x30] sm:$0xff]  ;;  %v213_v17 = vsel %vm203_vm2, %v678_v12, 0.0  ;;  %v688_v18 = vld [vmem:[%s652_s19 + $0x38] sm:$0xff]  ;;  %v693_v21 = vld [vmem:[%s652_s19 + $0x40] sm:$0xff] }
  0x13   : > { %v215_v20 = vsel %vm203_vm2, %v683_v15, 0.0  ;;  %v217_v23 = vsel %vm203_vm2, %v688_v18, 0.0  ;;  %v698_v24 = vld [vmem:[%s652_s19 + $0x48] sm:$0xff]  ;;  %v219_v26 = vsel %vm203_vm2, %v693_v21, 0.0  ;;  %v703_v27 = vld [vmem:[%s652_s19 + $0x50] sm:$0xff]  ;;  %v708_v30 = vld [vmem:[%s652_s19 + $0x58] sm:$0xff] }
  0x14   : > { %v208_v13 = vadd.f32 %v207_v8, %v206_v10  ;;  %v221_v29 = vsel %vm203_vm2, %v698_v24, 0.0  ;;  %v223_v32 = vsel %vm203_vm2, %v703_v27, 0.0  ;;  %v713_v33 = vld [vmem:[%s652_s19 + $0x60] sm:$0xff]  ;;  %v225_v35 = vsel %vm203_vm2, %v708_v30, 0.0  ;;  %v718_v36 = vld [vmem:[%s652_s19 + $0x68] sm:$0xff]  ;;  %v723_v39 = vld [vmem:[%s652_s19 + $0x70] sm:$0xff] }
  0x15   : > { %v227_v38 = vsel %vm203_vm2, %v713_v33, 0.0  ;;  %v229_v41 = vsel %vm203_vm2, %v718_v36, 0.0  ;;  %v728_v42 = vld [vmem:[%s652_s19 + $0x78] sm:$0xff]  ;;  %v231_v44 = vsel %vm203_vm2, %v723_v39, 0.0  ;;  %v733_v45 = vld [vmem:[%s652_s19 + $0x80] sm:$0xff]  ;;  %v738_v48 = vld [vmem:[%s652_s19 + $0x88] sm:$0xff] }
  0x16   : > { %v210_v16 = vadd.f32 %v209_v11, %v208_v13  ;;  %v233_v47 = vsel %vm203_vm2, %v728_v42, 0.0  ;;  %v235_v50 = vsel %vm203_vm2, %v733_v45, 0.0  ;;  %v743_v51 = vld [vmem:[%s652_s19 + $0x90] sm:$0xff]  ;;  %v237_v53 = vsel %vm203_vm2, %v738_v48, 0.0  ;;  %v748_v54 = vld [vmem:[%s652_s19 + $0x98] sm:$0xff]  ;;  %v753_v57 = vld [vmem:[%s652_s19 + $0xa0] sm:$0xff] }
  0x17   : > { %v239_v56 = vsel %vm203_vm2, %v743_v51, 0.0  ;;  %v241_v59 = vsel %vm203_vm2, %v748_v54, 0.0  ;;  %v758_v60 = vld [vmem:[%s652_s19 + $0xa8] sm:$0xff]  ;;  %v243_v62 = vsel %vm203_vm2, %v753_v57, 0.0  ;;  %v763_v63 = vld [vmem:[%s652_s19 + $0xb0] sm:$0xff]  ;;  %v768_v6 = vld [vmem:[%s652_s19 + $0xb8] sm:$0xff] }
  0x18   : > { %v212_v19 = vadd.f32 %v211_v14, %v210_v16  ;;  %v245_v1 = vsel %vm203_vm2, %v758_v60, 0.0  ;;  %v247_v8 = vsel %vm203_vm2, %v763_v63, 0.0  ;;  %v773_v10 = vld [vmem:[%s652_s19 + $0xc0] sm:$0xff]  ;;  %v249_v13 = vsel %vm203_vm2, %v768_v6, 0.0  ;;  %v778_v14 = vld [vmem:[%s652_s19 + $0xc8] sm:$0xff] }
  0x1a   : > { %v214_v22 = vadd.f32 %v213_v17, %v212_v19  ;;  %v251_v17 = vsel %vm203_vm2, %v773_v10, 0.0  ;;  %v783_v19 = vld [vmem:[%s652_s19 + $0xd0] sm:$0xff] }
  0x1c   : > { %v216_v25 = vadd.f32 %v215_v20, %v214_v22  ;;  %v253_v22 = vsel %vm203_vm2, %v778_v14, 0.0 }
  0x1e   : > { %v218_v28 = vadd.f32 %v217_v23, %v216_v25  ;;  %v788_v23 = vld [vmem:[%s652_s19 + $0xd8] sm:$0xff] }
  0x20   : > { %v220_v31 = vadd.f32 %v219_v26, %v218_v28  ;;  %v255_v26 = vsel %vm203_vm2, %v783_v19, 0.0  ;;  %v793_v28 = vld [vmem:[%s652_s19 + $0xe0] sm:$0xff] }
  0x22   : > { %v222_v34 = vadd.f32 %v221_v29, %v220_v31  ;;  %v257_v31 = vsel %vm203_vm2, %v788_v23, 0.0 }
  0x24   : > { %v224_v37 = vadd.f32 %v223_v32, %v222_v34  ;;  %v798_v32 = vld [vmem:[%s652_s19 + $0xe8] sm:$0xff] }
  0x26   : > { %v226_v40 = vadd.f32 %v225_v35, %v224_v37  ;;  %v259_v35 = vsel %vm203_vm2, %v793_v28, 0.0  ;;  %v803_v37 = vld [vmem:[%s652_s19 + $0xf0] sm:$0xff] }
  0x28   : > { %v228_v43 = vadd.f32 %v227_v38, %v226_v40  ;;  %v261_v40 = vsel %vm203_vm2, %v798_v32, 0.0 }
  0x2a   : > { %v230_v46 = vadd.f32 %v229_v41, %v228_v43  ;;  %v808_v41 = vld [vmem:[%s652_s19 + $0xf8] sm:$0xff] }
  0x2c   : > { %v232_v49 = vadd.f32 %v231_v44, %v230_v46  ;;  %v263_v44 = vsel %vm203_vm2, %v803_v37, 0.0 }
  0x2e   : > { %v234_v52 = vadd.f32 %v233_v47, %v232_v49  ;;  %v265_v47 = vsel %vm203_vm2, %v808_v41, 0.0 }
  0x30   : > { %v236_v55 = vadd.f32 %v235_v50, %v234_v52 }
  0x32   : > { %v238_v58 = vadd.f32 %v237_v53, %v236_v55 }
  0x34   : > { %v240_v61 = vadd.f32 %v239_v56, %v238_v58 }
  0x36   : > { %v242_v0 = vadd.f32 %v241_v59, %v240_v61 }
  0x38   : > { %v244_v7 = vadd.f32 %v243_v62, %v242_v0  ;;  %v354_v62 = vld [vmem:[%s926_s2] sm:$0xff] }
  0x39   : > { %585 = vmatpush3.msra.mxu1 %v354_v62 }
  0x3a   : > { %v246_v11 = vadd.f32 %v245_v1, %v244_v7 }
  0x3c   : > { %v248_v16 = vadd.f32 %v247_v8, %v246_v11 }
  0x3e   : > { %v250_v20 = vadd.f32 %v249_v13, %v248_v16 }
  0x40   : > { %v252_v25 = vadd.f32 %v251_v17, %v250_v20  ;;  %v435_v20 = vlaneseq }
  0x42   : > { %v254_v29 = vadd.f32 %v253_v22, %v252_v25  ;;  %v436_v22 = vshrl.u32 %v435_v20, 7 }
  0x44   : > { %v256_v34 = vadd.f32 %v255_v26, %v254_v29  ;;  %v437_v25 = vsub.s32 0, %v436_v22 }
  0x46   : > { %v258_v38 = vadd.f32 %v257_v31, %v256_v34 }
  0x48   : > { %v260_v43 = vadd.f32 %v259_v35, %v258_v38 }
  0x4a   : > { %v262_v46 = vadd.f32 %v261_v40, %v260_v43 }
  0x4c   : > { %v264_v49 = vadd.f32 %v263_v44, %v262_v46 }
  0x4e   : > { %v266_v50 = vadd.f32 %v265_v47, %v264_v49 }
  0x50   : > { %v267_v52 = vrot.slane %v266_v50, 4 }
  0x52   : > { %v268_v53 = vadd.f32 %v267_v52, %v266_v50 }
  0x54   : > { %v269_v55 = vrot.slane %v268_v53, 2 }
  0x56   : > { %v270_v56 = vadd.f32 %v269_v55, %v268_v53 }
  0x58   : > { %v271_v58 = vrot.slane %v270_v56, 1 }
  0x5a   : > { %v272_v59 = vadd.f32 %v271_v58, %v270_v56 }
  0x5c   : > { %v274_v61 = vmul.f32 0.00390625, %v272_v59 }
  0x5e   : > { %582 = vmatmul.mubr.msk.f32.vlgmr.msra.gmra.mrb[0].mxu0 %vm203_vm2, %v274_v61 }
 0x131   : > { %v349_v0 = vpop.f32.mrb[0].mxu0 }
 0x132   : > { %v353_v1 = vmax.f32 %v349_v0, 0.0  ;;  %v583_v7 = vpop.f32.mrb[1].mxu0 }
 0x134   : > { %587 = vmatmul.mubr.msk.f32.vlgmr.msra.gmra.mrb[0].mxu1 %vm355_vm3, %v353_v1 }
 0x207   : > { %v425_v8 = vpop.f32.mrb[0].mxu1 }
 0x208   : > { %v570_v11 = vmul.f32 -1.442695, %v425_v8  ;;  %v588_v13 = vpop.f32.mrb[1].mxu1 }
 0x20a   : > { %599 = vpow2.f32 %v570_v11 }
 0x214   : > { %v600_v16 = vpop.eup %599 }
 0x215   : > { %v432_v17 = vadd.f32 1.0, %v600_v16 }
 0x217   : > { %601 = vrcp.f32 %v432_v17 }
 0x221   : > { %v602_v26 = vpop.eup %601 }
 0x222   : > { %v438_v29 = vrot.slane %v602_v26, %v437_v25 }
 0x224   : > { %v439_v31 = vmul.f32 %v438_v29, %v655_v2  ;;  %v440_v34 = vmul.f32 %v438_v29, %v658_v3  ;;  %v441_v35 = vmul.f32 %v438_v29, %v661_v4  ;;  %v442_v38 = vmul.f32 %v438_v29, %v664_v5 }
 0x225   : > { %v443_v40 = vmul.f32 %v438_v29, %v673_v9  ;;  %v444_v43 = vmul.f32 %v438_v29, %v678_v12  ;;  %v445_v44 = vmul.f32 %v438_v29, %v683_v15  ;;  %v446_v46 = vmul.f32 %v438_v29, %v688_v18 }
 0x226   : > { %v447_v2 = vmul.f32 %v438_v29, %v693_v21  ;;  %v448_v3 = vmul.f32 %v438_v29, %v698_v24  ;;  %v449_v4 = vmul.f32 %v438_v29, %v703_v27  ;;  %v450_v5 = vmul.f32 %v438_v29, %v708_v30  ;;  %471 = vst.msk [vmem:[%s823_s24] sm:$0xff] %vm203_vm2, %v439_v31 }
 0x227   : > { %472 = vst.msk [vmem:[%s823_s24 + $0x8] sm:$0xff] %vm203_vm2, %v440_v34  ;;  %473 = vst.msk [vmem:[%s823_s24 + $0x10] sm:$0xff] %vm203_vm2, %v441_v35  ;;  %v451_v9 = vmul.f32 %v438_v29, %v713_v33  ;;  %v452_v12 = vmul.f32 %v438_v29, %v718_v36  ;;  %v453_v15 = vmul.f32 %v438_v29, %v723_v39 }
 0x228   : > { %474 = vst.msk [vmem:[%s823_s24 + $0x18] sm:$0xff] %vm203_vm2, %v442_v38  ;;  %v454_v18 = vmul.f32 %v438_v29, %v728_v42  ;;  %475 = vst.msk [vmem:[%s823_s24 + $0x20] sm:$0xff] %vm203_vm2, %v443_v40  ;;  %v455_v21 = vmul.f32 %v438_v29, %v733_v45  ;;  %v456_v24 = vmul.f32 %v438_v29, %v738_v48 }
 0x229   : > { %476 = vst.msk [vmem:[%s823_s24 + $0x28] sm:$0xff] %vm203_vm2, %v444_v43  ;;  %477 = vst.msk [vmem:[%s823_s24 + $0x30] sm:$0xff] %vm203_vm2, %v445_v44  ;;  %v457_v27 = vmul.f32 %v438_v29, %v743_v51  ;;  %v458_v30 = vmul.f32 %v438_v29, %v748_v54  ;;  %v459_v33 = vmul.f32 %v438_v29, %v753_v57 }
 0x22a   : > { %478 = vst.msk [vmem:[%s823_s24 + $0x38] sm:$0xff] %vm203_vm2, %v446_v46  ;;  %479 = vst.msk [vmem:[%s823_s24 + $0x40] sm:$0xff] %vm203_vm2, %v447_v2  ;;  %v460_v36 = vmul.f32 %v438_v29, %v758_v60  ;;  %v461_v39 = vmul.f32 %v438_v29, %v763_v63  ;;  %v462_v42 = vmul.f32 %v438_v29, %v768_v6 }
 0x22b   : > { %480 = vst.msk [vmem:[%s823_s24 + $0x48] sm:$0xff] %vm203_vm2, %v448_v3  ;;  %481 = vst.msk [vmem:[%s823_s24 + $0x50] sm:$0xff] %vm203_vm2, %v449_v4  ;;  %v463_v45 = vmul.f32 %v438_v29, %v773_v10  ;;  %v464_v48 = vmul.f32 %v438_v29, %v778_v14  ;;  %v465_v51 = vmul.f32 %v438_v29, %v783_v19 }
 0x22c   : > { %482 = vst.msk [vmem:[%s823_s24 + $0x58] sm:$0xff] %vm203_vm2, %v450_v5  ;;  %483 = vst.msk [vmem:[%s823_s24 + $0x60] sm:$0xff] %vm203_vm2, %v451_v9  ;;  %v466_v54 = vmul.f32 %v438_v29, %v788_v23  ;;  %v467_v57 = vmul.f32 %v438_v29, %v793_v28  ;;  %v468_v60 = vmul.f32 %v438_v29, %v798_v32 }
 0x22d   : > { %484 = vst.msk [vmem:[%s823_s24 + $0x68] sm:$0xff] %vm203_vm2, %v452_v12  ;;  %485 = vst.msk [vmem:[%s823_s24 + $0x70] sm:$0xff] %vm203_vm2, %v453_v15  ;;  %v469_v63 = vmul.f32 %v438_v29, %v803_v37  ;;  %v470_v6 = vmul.f32 %v438_v29, %v808_v41 }
 0x22e   : > { %486 = vst.msk [vmem:[%s823_s24 + $0x78] sm:$0xff] %vm203_vm2, %v454_v18  ;;  %487 = vst.msk [vmem:[%s823_s24 + $0x80] sm:$0xff] %vm203_vm2, %v455_v21 }
 0x22f   : > { %488 = vst.msk [vmem:[%s823_s24 + $0x88] sm:$0xff] %vm203_vm2, %v456_v24  ;;  %489 = vst.msk [vmem:[%s823_s24 + $0x90] sm:$0xff] %vm203_vm2, %v457_v27 }
 0x230   : > { %490 = vst.msk [vmem:[%s823_s24 + $0x98] sm:$0xff] %vm203_vm2, %v458_v30  ;;  %491 = vst.msk [vmem:[%s823_s24 + $0xa0] sm:$0xff] %vm203_vm2, %v459_v33 }
 0x231   : > { %492 = vst.msk [vmem:[%s823_s24 + $0xa8] sm:$0xff] %vm203_vm2, %v460_v36  ;;  %493 = vst.msk [vmem:[%s823_s24 + $0xb0] sm:$0xff] %vm203_vm2, %v461_v39 }
 0x232   : > { %494 = vst.msk [vmem:[%s823_s24 + $0xb8] sm:$0xff] %vm203_vm2, %v462_v42  ;;  %495 = vst.msk [vmem:[%s823_s24 + $0xc0] sm:$0xff] %vm203_vm2, %v463_v45 }
 0x233   : > { %496 = vst.msk [vmem:[%s823_s24 + $0xc8] sm:$0xff] %vm203_vm2, %v464_v48  ;;  %497 = vst.msk [vmem:[%s823_s24 + $0xd0] sm:$0xff] %vm203_vm2, %v465_v51 }
 0x234   : > { %498 = vst.msk [vmem:[%s823_s24 + $0xd8] sm:$0xff] %vm203_vm2, %v466_v54  ;;  %499 = vst.msk [vmem:[%s823_s24 + $0xe0] sm:$0xff] %vm203_vm2, %v467_v57 }
 0x235   : > { %500 = vst.msk [vmem:[%s823_s24 + $0xe8] sm:$0xff] %vm203_vm2, %v468_v60  ;;  %501 = vst.msk [vmem:[%s823_s24 + $0xf0] sm:$0xff] %vm203_vm2, %v469_v63 }
 0x236   : > { %502 = vst.msk [vmem:[%s823_s24 + $0xf8] sm:$0xff] %vm203_vm2, %v470_v6 }
 0x237 PF: > { %s13_s12 = sadd.s32 1, %s609_s12  }
 0x238   : > { %p10_p4 = scmp.ge.s32.totalorder %s13_s12, 4  }
 0x23a   :  { %12 = sbr.rel (!%p10_p4) target bundleno = 1 (0x1), region = 62 }

</bundles_post_ra>
